<compile_context>
chip_gen: v7x
topology: tpu7x:2x2x1
jax: 0.10.0
libtpu: 0.0.40
codegen_flags: <defaults>
</compile_context>

<pallas_src>
import numpy as np
import jax
import jax.numpy as jnp
from jax.experimental import pallas as pl
from jax.experimental.pallas import tpu as pltpu


# ---------------------------------------------------------------------------
# Deterministic "parameters": JPEG standard quantization tables + DCT matrix
# ---------------------------------------------------------------------------

_LUMA_TBL = np.array(
    [[16, 11, 10, 16, 24, 40, 51, 61],
     [12, 12, 14, 19, 26, 58, 60, 55],
     [14, 13, 16, 24, 40, 57, 69, 56],
     [14, 17, 22, 29, 51, 87, 80, 62],
     [18, 22, 37, 56, 68, 109, 103, 77],
     [24, 35, 55, 64, 81, 104, 113, 92],
     [49, 64, 78, 87, 103, 121, 120, 101],
     [72, 92, 95, 98, 112, 100, 103, 99]], dtype=np.float32)

_CHROMA_TBL = np.array(
    [[17, 18, 24, 47, 99, 99, 99, 99],
     [18, 21, 26, 66, 99, 99, 99, 99],
     [24, 26, 56, 99, 99, 99, 99, 99],
     [47, 66, 99, 99, 99, 99, 99, 99],
     [99, 99, 99, 99, 99, 99, 99, 99],
     [99, 99, 99, 99, 99, 99, 99, 99],
     [99, 99, 99, 99, 99, 99, 99, 99],
     [99, 99, 99, 99, 99, 99, 99, 99]], dtype=np.float32)


def _dct_coff():
    """8x8 orthonormal DCT-II matrix, exactly as built by the reference."""
    coff = np.zeros((8, 8), dtype=np.float64)
    coff[0, :] = np.sqrt(1.0 / 8.0)
    for i in range(1, 8):
        for j in range(8):
            coff[i, j] = np.cos(np.pi * i * (2 * j + 1) / 16.0) * np.sqrt(2.0 / 8.0)
    return coff


def _blockdiag_dct(n):
    """kron(I_{n//8}, C): per-8x8-block DCT along one axis as a single matmul."""
    return np.kron(np.eye(n // 8), _dct_coff()).astype(np.float32)


def _sub_select(n):
    """0/1 selection matrix S with S[i, i - i%2] = 1 (replicate even rows)."""
    s = np.zeros((n, n), dtype=np.float64)
    idx = np.arange(n)
    s[idx, idx - (idx % 2)] = 1.0
    return s


def _quant_tiles(scale_factor, th, tw):
    lq = np.clip(np.round(_LUMA_TBL * scale_factor), 1.0, None).astype(np.float32)
    cq = np.clip(np.round(_CHROMA_TBL * scale_factor), 1.0, None).astype(np.float32)
    lq = np.tile(lq, (th // 8, tw // 8)).astype(np.float32)
    cq = np.tile(cq, (th // 8, tw // 8)).astype(np.float32)
    return lq, cq


# ---------------------------------------------------------------------------
# Tile-size selection (generation-aware, bounded padding overhead)
# ---------------------------------------------------------------------------

def _round_up(x, m):
    return ((x + m - 1) // m) * m


def _mxu_dim():
    """128 for 128x128-MXU generations (<= v5), 256 for v6e / v7x."""
    try:
        kind = jax.devices()[0].device_kind.lower()
    except Exception:
        return 256
    for tag in ("v2", "v3", "v4", "v5"):
        if tag in kind:
            return 128
    return 256


def _pick_tile(size, base, cap, max_overhead=0.25):
    """Largest tile (multiple of `base`, <= cap) with padding overhead <= 25%."""
    size = _round_up(max(int(size), 1), base)
    hi = min(cap, size)
    best = base
    for t in range(base, hi + 1, base):
        if _round_up(size, t) - size <= max_overhead * size:
            best = t
    return best


# ---------------------------------------------------------------------------
# Pallas kernel (one (3, TH, TW) spatial tile of one batch element per step)
# ---------------------------------------------------------------------------

def _make_jpeg_kernel(TH, subsample, use_bf16_dct=False):
    mm_dtype = jnp.bfloat16 if use_bf16_dct else jnp.float32

    def mm(a, b):
        return jnp.dot(a.astype(mm_dtype), b.astype(mm_dtype),
                       preferred_element_type=jnp.float32)

    def kernel(*refs):
        if subsample == 2:
            (x_ref, dh_ref, dht_ref, dw_ref, dwt_ref,
             dhc_ref, dwtc_ref, q_ref, invq_ref, o_ref) = refs
        else:
            (x_ref, dh_ref, dht_ref, dw_ref, dwt_ref,
             q_ref, invq_ref, o_ref) = refs

        # ---- fused pre-scale: clamp to [-1,1], map to [0,255] ----
        def load(c):
            v = x_ref[c]                              # (TH, TW)
            return (jnp.clip(v, -1.0, 1.0) + 1.0) * 127.5

        r, g, b = load(0), load(1), load(2)

        # RGB -> YUV
        y = 0.299 * r + 0.587 * g + 0.114 * b
        u = -0.1687 * r - 0.3313 * g + 0.5 * b
        v = 0.5 * r - 0.4187 * g - 0.0813 * b

        dh = dh_ref[...]      # (TH, TH)  kron(I, C)
        dht = dht_ref[...]    # (TH, TH)  dh.T (precomputed on host)
        dw = dw_ref[...]      # (TW, TW)
        dwt = dwt_ref[...]    # (TW, TW)  dw.T (precomputed on host)
        if subsample == 2:
            dhc = dhc_ref[...]    # dh @ S_h   (4:2:0 fold, luma-consistent)
            dwtc = dwtc_ref[...]  # S_w.T @ dw.T
        else:
            dhc, dwtc = dh, dwt

        # Quant slab rows [0:TH] = luma, [TH:2TH] = chroma (8-aligned slices).
        lq = q_ref[pl.ds(0, TH), :]
        cq = q_ref[pl.ds(TH, TH), :]
        inv_lq = invq_ref[pl.ds(0, TH), :]
        inv_cq = invq_ref[pl.ds(TH, TH), :]

        # ---- forward DCT per channel: D = L @ Y @ R^T (selection folded) ----
        def fdct(ch, left, right_t):
            return mm(left, mm(ch, right_t))

        dy = fdct(y, dh, dwt)
        du = fdct(u, dhc, dwtc)
        dv = fdct(v, dhc, dwtc)

        # ---- quantize / dequantize in f32 (reciprocal-multiply, no divide) --
        qy = jnp.round(dy * inv_lq) * lq
        qu = jnp.round(du * inv_cq) * cq
        qv = jnp.round(dv * inv_cq) * cq

        # ---- inverse DCT per channel: R = dh.T @ Q @ dw ----
        def idct(ch):
            return mm(dht, mm(ch, dw))

        yr, ur, vr = idct(qy), idct(qu), idct(qv)

        # YUV -> RGB, fused post-scale to [-1, 1] + clamp
        rr = yr + 1.40198758 * vr
        gg = yr - 0.344113281 * ur - 0.714103821 * vr
        bb = yr + 1.77197812 * ur

        s = 2.0 / 255.0
        o_ref[0] = jnp.clip(rr * s - 1.0, -1.0, 1.0)
        o_ref[1] = jnp.clip(gg * s - 1.0, -1.0, 1.0)
        o_ref[2] = jnp.clip(bb * s - 1.0, -1.0, 1.0)

    return kernel


# ---------------------------------------------------------------------------
# Wrapper (only pad + crop remain outside the kernel)
# ---------------------------------------------------------------------------

def jpeg_forward(image, Q=50, subsample=0, use_bf16_dct=False):
    """image: float32 NCHW with 3 channels, values nominally in [-1, 1]."""
    image = jnp.asarray(image, jnp.float32)
    N, C, H, W = image.shape
    assert C == 3, "Jpeg noise layer expects RGB (3 channels)."
    scale_factor = (2.0 - Q * 0.02) if Q >= 50 else 50.0 / Q

    mxu = _mxu_dim()
    TH = _pick_tile(H, 8, mxu)                       # multiple of 8, <= MXU dim
    TW = _pick_tile(W, 128, 256 if mxu >= 256 else 128)   # lane-dense width
    Hp = _round_up(H, TH)
    Wp = _round_up(W, TW)

    # Pad with -1.0: after the in-kernel (clip+1)*127.5 this is exactly 0,
    # matching the reference's ZeroPad2d on the [0,255]-scaled image. Blocks
    # made entirely of padding pass through the pipeline as exact zeros and
    # are cropped below.
    x = jnp.pad(image, ((0, 0), (0, 0), (0, Hp - H), (0, Wp - W)),
                constant_values=-1.0)

    dh = _blockdiag_dct(TH)
    dw = _blockdiag_dct(TW)
    dht = np.ascontiguousarray(dh.T)
    dwt = np.ascontiguousarray(dw.T)
    lq, cq = _quant_tiles(scale_factor, TH, TW)
    qslab = np.concatenate([lq, cq], axis=0).astype(np.float32)   # (2*TH, TW)
    inv_qslab = (1.0 / qslab).astype(np.float32)

    img_spec = pl.BlockSpec((None, 3, TH, TW), lambda n, i, j: (n, 0, i, j))

    def cspec(shape):
        return pl.BlockSpec(shape, lambda n, i, j: (0,) * len(shape))

    inputs = [x, jnp.asarray(dh), jnp.asarray(dht),
              jnp.asarray(dw), jnp.asarray(dwt)]
    in_specs = [img_spec, cspec((TH, TH)), cspec((TH, TH)),
                cspec((TW, TW)), cspec((TW, TW))]

    if subsample == 2:
        # Fold 4:2:0 selection into the chroma forward-DCT constants (exact by
        # linearity; built from the same dh/dw as luma).
        sh = _sub_select(TH)
        sw = _sub_select(TW)
        dhc = (dh.astype(np.float64) @ sh).astype(np.float32)
        dwtc = (sw.T @ dwt.astype(np.float64)).astype(np.float32)
        inputs += [jnp.asarray(dhc), jnp.asarray(dwtc)]
        in_specs += [cspec((TH, TH)), cspec((TW, TW))]

    inputs += [jnp.asarray(qslab), jnp.asarray(inv_qslab)]
    in_specs += [cspec((2 * TH, TW)), cspec((2 * TH, TW))]

    grid = (N, Hp // TH, Wp // TW)
    steps = N * (Hp // TH) * (Wp // TW)
    flops = steps * 3 * 4 * TH * TW * (TH + TW)
    const_bytes = 4 * (2 * TH * TH + 2 * TW * TW + 2 * 2 * TH * TW
                       + (TH * TH + TW * TW if subsample == 2 else 0))
    bytes_accessed = 2 * N * 3 * Hp * Wp * 4 + const_bytes

    out = pl.pallas_call(
        _make_jpeg_kernel(TH, subsample, use_bf16_dct),
        out_shape=jax.ShapeDtypeStruct((N, 3, Hp, Wp), jnp.float32),
        grid=grid,
        in_specs=in_specs,
        out_specs=img_spec,
        compiler_params=pltpu.CompilerParams(
            dimension_semantics=("parallel", "parallel", "parallel")),
        cost_estimate=pl.CostEstimate(flops=int(flops), transcendentals=0,
                                      bytes_accessed=int(bytes_accessed)),
    )(*inputs)

    return out[:, :, :H, :W]


# ---------------------------------------------------------------------------
# Pure-JAX reference (full-size block-diagonal matrices, no Pallas) for the
# in-script correctness check.
# ---------------------------------------------------------------------------

def jpeg_forward_ref(image, Q=50, subsample=0):
    image = jnp.asarray(image, jnp.float32)
    N, C, H, W = image.shape
    scale_factor = (2.0 - Q * 0.02) if Q >= 50 else 50.0 / Q
    x = (jnp.clip(image, -1.0, 1.0) + 1.0) * 255.0 / 2.0
    pad_h = (8 - H % 8) % 8
    pad_w = (8 - W % 8) % 8
    x = jnp.pad(x, ((0, 0), (0, 0), (0, pad_h), (0, pad_w)))
    Hp, Wp = H + pad_h, W + pad_w

    r, g, b = x[:, 0], x[:, 1], x[:, 2]
    y = 0.299 * r + 0.587 * g + 0.114 * b
    u = -0.1687 * r - 0.3313 * g + 0.5 * b
    v = 0.5 * r - 0.4187 * g - 0.0813 * b
    if subsample == 2:
        rsel = (np.arange(Hp) // 2) * 2
        csel = (np.arange(Wp) // 2) * 2
        u = u[:, rsel][:, :, csel]
        v = v[:, rsel][:, :, csel]
    yuv = jnp.stack([y, u, v], axis=1)                       # (N, 3, Hp, Wp)

    dh = jnp.asarray(_blockdiag_dct(Hp))
    dw = jnp.asarray(_blockdiag_dct(Wp))
    lq, cq = _quant_tiles(scale_factor, Hp, Wp)
    tbl = jnp.asarray(np.stack([lq, cq, cq], axis=0)[None])
    inv_tbl = jnp.asarray((1.0 / np.stack([lq, cq, cq], axis=0))[None].astype(np.float32))

    a = jnp.einsum("nchw,jw->nchj", yuv, dw)                 # Y @ dw.T
    d = jnp.einsum("ih,nchj->ncij", dh, a)                   # dh @ (.)
    # reciprocal-multiply quantization mirrors the kernel (== divide except at
    # exact rounding boundaries)
    q = jnp.round(d * inv_tbl) * tbl
    e = jnp.einsum("ncij,jw->nciw", q, dw)                   # Q @ dw
    rec = jnp.einsum("ih,nciw->nchw", dh, e)                 # dh.T @ (.)

    yy, uu, vv = rec[:, 0], rec[:, 1], rec[:, 2]
    rr = yy + 1.40198758 * vv
    gg = yy - 0.344113281 * uu - 0.714103821 * vv
    bb = yy + 1.77197812 * uu
    out = jnp.stack([rr, gg, bb], axis=1)
    out = out[:, :, :H, :W]
    out = out * 2.0 / 255.0 - 1.0
    return jnp.clip(out, -1.0, 1.0)


def _check(name, out, ref):
    out = np.asarray(out)
    ref = np.asarray(ref)
    assert out.shape == ref.shape and out.dtype == np.float32
    diff = np.abs(out - ref)
    med = float(np.median(diff))
    mx = float(diff.max())
    frac = float(np.mean(diff > 2e-2))
    # JPEG quantization uses round(): an input landing numerically on a
    # rounding boundary can legitimately flip one whole 8x8 block between two
    # implementations, so tolerate a small fraction of >2e-2 deviations but no
    # gross or systematic errors.
    assert med < 1e-3, f"{name}: median abs diff {med:.2e}"
    assert mx < 0.75, f"{name}: max abs diff {mx:.3f}"
    assert frac < 0.15, f"{name}: {frac * 100:.1f}% elements differ by > 2e-2"


if __name__ == "__main__":
    key = jax.random.PRNGKey(0)
    k1, k2 = jax.random.split(key)

    # Small NCHW RGB batch consistent with the module's expectations.
    x1 = jax.random.uniform(k1, (2, 3, 16, 16), jnp.float32, minval=-1.0, maxval=1.0)

    out = jax.block_until_ready(jpeg_forward(x1, Q=50, subsample=0))
    ref = jax.block_until_ready(jpeg_forward_ref(x1, Q=50, subsample=0))
    _check("Q=50 subsample=0", out, ref)

    out2 = jax.block_until_ready(jpeg_forward(x1, Q=50, subsample=2))
    ref2 = jax.block_until_ready(jpeg_forward_ref(x1, Q=50, subsample=2))
    _check("Q=50 subsample=2", out2, ref2)

    # Non-multiple-of-8 spatial dims exercise the pad / crop path.
    x2 = jax.random.uniform(k2, (1, 3, 20, 36), jnp.float32, minval=-1.0, maxval=1.0)
    out3 = jax.block_until_ready(jpeg_forward(x2, Q=80, subsample=0))
    ref3 = jax.block_until_ready(jpeg_forward_ref(x2, Q=80, subsample=0))
    _check("Q=80 subsample=0", out3, ref3)

    print("KERNEL_OK")
</pallas_src>

<mosaic_0001>
module attributes {stable_mosaic.version = 11 : i64} {
  func.func @kernel(%arg0: i32, %arg1: i32, %arg2: i32, %arg3: memref<1x3x16x128xf32, #tpu.memory_space<vmem>>, %arg4: memref<16x16xf32, #tpu.memory_space<vmem>>, %arg5: memref<16x16xf32, #tpu.memory_space<vmem>>, %arg6: memref<128x128xf32, #tpu.memory_space<vmem>>, %arg7: memref<128x128xf32, #tpu.memory_space<vmem>>, %arg8: memref<32x128xf32, #tpu.memory_space<vmem>>, %arg9: memref<32x128xf32, #tpu.memory_space<vmem>>, %arg10: memref<1x3x16x128xf32, #tpu.memory_space<vmem>>) attributes {dimension_semantics = [#tpu.dimension_semantics<parallel>, #tpu.dimension_semantics<parallel>, #tpu.dimension_semantics<parallel>], iteration_bounds = array<i64: 2, 1, 1>, scalar_prefetch = 0 : i64, scratch_operands = 0 : i64, tpu.core_type = #tpu.core_type<tc>, window_params = [{transform_indices = @transform_0, window_bounds = array<i64: 1, 3, 16, 128>}, {pipeline_mode = #tpu.pipeline_mode<synchronous>, transform_indices = @transform_1, window_bounds = array<i64: 16, 16>}, {pipeline_mode = #tpu.pipeline_mode<synchronous>, transform_indices = @transform_2, window_bounds = array<i64: 16, 16>}, {pipeline_mode = #tpu.pipeline_mode<synchronous>, transform_indices = @transform_3, window_bounds = array<i64: 128, 128>}, {pipeline_mode = #tpu.pipeline_mode<synchronous>, transform_indices = @transform_4, window_bounds = array<i64: 128, 128>}, {pipeline_mode = #tpu.pipeline_mode<synchronous>, transform_indices = @transform_5, window_bounds = array<i64: 32, 128>}, {pipeline_mode = #tpu.pipeline_mode<synchronous>, transform_indices = @transform_6, window_bounds = array<i64: 32, 128>}, {transform_indices = @transform_7, window_bounds = array<i64: 1, 3, 16, 128>}]} {
    %c0 = arith.constant 0 : index
    %c0_0 = arith.constant 0 : index
    %c0_1 = arith.constant 0 : index
    %c0_2 = arith.constant 0 : index
    %0 = vector.load %arg3[%c0, %c0_0, %c0_1, %c0_2] : memref<1x3x16x128xf32, #tpu.memory_space<vmem>>, vector<1x1x16x128xf32>
    %1 = vector.shape_cast %0 : vector<1x1x16x128xf32> to vector<16x128xf32>
    %cst = arith.constant -1.000000e+00 : f32
    %cst_3 = arith.constant 1.000000e+00 : f32
    %2 = vector.broadcast %cst : f32 to vector<16x128xf32>
    %3 = arith.maximumf %2, %1 : vector<16x128xf32>
    %4 = vector.broadcast %cst_3 : f32 to vector<16x128xf32>
    %5 = arith.minimumf %4, %3 : vector<16x128xf32>
    %cst_4 = arith.constant 1.000000e+00 : f32
    %6 = vector.broadcast %cst_4 : f32 to vector<16x128xf32>
    %7 = arith.addf %5, %6 : vector<16x128xf32>
    %cst_5 = arith.constant 1.275000e+02 : f32
    %8 = vector.broadcast %cst_5 : f32 to vector<16x128xf32>
    %9 = arith.mulf %7, %8 : vector<16x128xf32>
    %c0_6 = arith.constant 0 : index
    %c1 = arith.constant 1 : index
    %c0_7 = arith.constant 0 : index
    %c0_8 = arith.constant 0 : index
    %10 = vector.load %arg3[%c0_6, %c1, %c0_7, %c0_8] : memref<1x3x16x128xf32, #tpu.memory_space<vmem>>, vector<1x1x16x128xf32>
    %11 = vector.shape_cast %10 : vector<1x1x16x128xf32> to vector<16x128xf32>
    %cst_9 = arith.constant -1.000000e+00 : f32
    %cst_10 = arith.constant 1.000000e+00 : f32
    %12 = vector.broadcast %cst_9 : f32 to vector<16x128xf32>
    %13 = arith.maximumf %12, %11 : vector<16x128xf32>
    %14 = vector.broadcast %cst_10 : f32 to vector<16x128xf32>
    %15 = arith.minimumf %14, %13 : vector<16x128xf32>
    %cst_11 = arith.constant 1.000000e+00 : f32
    %16 = vector.broadcast %cst_11 : f32 to vector<16x128xf32>
    %17 = arith.addf %15, %16 : vector<16x128xf32>
    %cst_12 = arith.constant 1.275000e+02 : f32
    %18 = vector.broadcast %cst_12 : f32 to vector<16x128xf32>
    %19 = arith.mulf %17, %18 : vector<16x128xf32>
    %c0_13 = arith.constant 0 : index
    %c2 = arith.constant 2 : index
    %c0_14 = arith.constant 0 : index
    %c0_15 = arith.constant 0 : index
    %20 = vector.load %arg3[%c0_13, %c2, %c0_14, %c0_15] : memref<1x3x16x128xf32, #tpu.memory_space<vmem>>, vector<1x1x16x128xf32>
    %21 = vector.shape_cast %20 : vector<1x1x16x128xf32> to vector<16x128xf32>
    %cst_16 = arith.constant -1.000000e+00 : f32
    %cst_17 = arith.constant 1.000000e+00 : f32
    %22 = vector.broadcast %cst_16 : f32 to vector<16x128xf32>
    %23 = arith.maximumf %22, %21 : vector<16x128xf32>
    %24 = vector.broadcast %cst_17 : f32 to vector<16x128xf32>
    %25 = arith.minimumf %24, %23 : vector<16x128xf32>
    %cst_18 = arith.constant 1.000000e+00 : f32
    %26 = vector.broadcast %cst_18 : f32 to vector<16x128xf32>
    %27 = arith.addf %25, %26 : vector<16x128xf32>
    %cst_19 = arith.constant 1.275000e+02 : f32
    %28 = vector.broadcast %cst_19 : f32 to vector<16x128xf32>
    %29 = arith.mulf %27, %28 : vector<16x128xf32>
    %cst_20 = arith.constant 2.990000e-01 : f32
    %30 = vector.broadcast %cst_20 : f32 to vector<16x128xf32>
    %31 = arith.mulf %30, %9 : vector<16x128xf32>
    %cst_21 = arith.constant 5.870000e-01 : f32
    %32 = vector.broadcast %cst_21 : f32 to vector<16x128xf32>
    %33 = arith.mulf %32, %19 : vector<16x128xf32>
    %34 = arith.addf %31, %33 : vector<16x128xf32>
    %cst_22 = arith.constant 1.140000e-01 : f32
    %35 = vector.broadcast %cst_22 : f32 to vector<16x128xf32>
    %36 = arith.mulf %35, %29 : vector<16x128xf32>
    %37 = arith.addf %34, %36 : vector<16x128xf32>
    %cst_23 = arith.constant -1.687000e-01 : f32
    %38 = vector.broadcast %cst_23 : f32 to vector<16x128xf32>
    %39 = arith.mulf %38, %9 : vector<16x128xf32>
    %cst_24 = arith.constant 3.313000e-01 : f32
    %40 = vector.broadcast %cst_24 : f32 to vector<16x128xf32>
    %41 = arith.mulf %40, %19 : vector<16x128xf32>
    %42 = arith.subf %39, %41 : vector<16x128xf32>
    %cst_25 = arith.constant 5.000000e-01 : f32
    %43 = vector.broadcast %cst_25 : f32 to vector<16x128xf32>
    %44 = arith.mulf %43, %29 : vector<16x128xf32>
    %45 = arith.addf %42, %44 : vector<16x128xf32>
    %cst_26 = arith.constant 5.000000e-01 : f32
    %46 = vector.broadcast %cst_26 : f32 to vector<16x128xf32>
    %47 = arith.mulf %46, %9 : vector<16x128xf32>
    %cst_27 = arith.constant 4.187000e-01 : f32
    %48 = vector.broadcast %cst_27 : f32 to vector<16x128xf32>
    %49 = arith.mulf %48, %19 : vector<16x128xf32>
    %50 = arith.subf %47, %49 : vector<16x128xf32>
    %cst_28 = arith.constant 0.0812999978 : f32
    %51 = vector.broadcast %cst_28 : f32 to vector<16x128xf32>
    %52 = arith.mulf %51, %29 : vector<16x128xf32>
    %53 = arith.subf %50, %52 : vector<16x128xf32>
    %c0_29 = arith.constant 0 : index
    %c0_30 = arith.constant 0 : index
    %54 = vector.load %arg4[%c0_29, %c0_30] : memref<16x16xf32, #tpu.memory_space<vmem>>, vector<16x16xf32>
    %c0_31 = arith.constant 0 : index
    %c0_32 = arith.constant 0 : index
    %55 = vector.load %arg5[%c0_31, %c0_32] : memref<16x16xf32, #tpu.memory_space<vmem>>, vector<16x16xf32>
    %c0_33 = arith.constant 0 : index
    %c0_34 = arith.constant 0 : index
    %56 = vector.load %arg6[%c0_33, %c0_34] : memref<128x128xf32, #tpu.memory_space<vmem>>, vector<128x128xf32>
    %c0_35 = arith.constant 0 : index
    %c0_36 = arith.constant 0 : index
    %57 = vector.load %arg7[%c0_35, %c0_36] : memref<128x128xf32, #tpu.memory_space<vmem>>, vector<128x128xf32>
    %c0_37 = arith.constant 0 : index
    %c0_38 = arith.constant 0 : index
    %58 = vector.load %arg8[%c0_37, %c0_38] : memref<32x128xf32, #tpu.memory_space<vmem>>, vector<16x128xf32>
    %c16 = arith.constant 16 : index
    %c0_39 = arith.constant 0 : index
    %59 = vector.load %arg8[%c16, %c0_39] : memref<32x128xf32, #tpu.memory_space<vmem>>, vector<16x128xf32>
    %c0_40 = arith.constant 0 : index
    %c0_41 = arith.constant 0 : index
    %60 = vector.load %arg9[%c0_40, %c0_41] : memref<32x128xf32, #tpu.memory_space<vmem>>, vector<16x128xf32>
    %c16_42 = arith.constant 16 : index
    %c0_43 = arith.constant 0 : index
    %61 = vector.load %arg9[%c16_42, %c0_43] : memref<32x128xf32, #tpu.memory_space<vmem>>, vector<16x128xf32>
    %cst_44 = arith.constant dense<0.000000e+00> : vector<16x128xf32>
    %62 = tpu.matmul %37, %57, %cst_44 {dimension_numbers = #tpu.dot_dimension_numbers<[1], [0], [0], [1], [0, 0, 1, 1], [], []>} : vector<16x128xf32>, vector<128x128xf32>, vector<16x128xf32> -> vector<16x128xf32>
    %cst_45 = arith.constant dense<0.000000e+00> : vector<16x128xf32>
    %63 = tpu.matmul %54, %62, %cst_45 {dimension_numbers = #tpu.dot_dimension_numbers<[1], [0], [0], [1], [0, 0, 1, 1], [], []>} : vector<16x16xf32>, vector<16x128xf32>, vector<16x128xf32> -> vector<16x128xf32>
    %cst_46 = arith.constant dense<0.000000e+00> : vector<16x128xf32>
    %64 = tpu.matmul %45, %57, %cst_46 {dimension_numbers = #tpu.dot_dimension_numbers<[1], [0], [0], [1], [0, 0, 1, 1], [], []>} : vector<16x128xf32>, vector<128x128xf32>, vector<16x128xf32> -> vector<16x128xf32>
    %cst_47 = arith.constant dense<0.000000e+00> : vector<16x128xf32>
    %65 = tpu.matmul %54, %64, %cst_47 {dimension_numbers = #tpu.dot_dimension_numbers<[1], [0], [0], [1], [0, 0, 1, 1], [], []>} : vector<16x16xf32>, vector<16x128xf32>, vector<16x128xf32> -> vector<16x128xf32>
    %cst_48 = arith.constant dense<0.000000e+00> : vector<16x128xf32>
    %66 = tpu.matmul %53, %57, %cst_48 {dimension_numbers = #tpu.dot_dimension_numbers<[1], [0], [0], [1], [0, 0, 1, 1], [], []>} : vector<16x128xf32>, vector<128x128xf32>, vector<16x128xf32> -> vector<16x128xf32>
    %cst_49 = arith.constant dense<0.000000e+00> : vector<16x128xf32>
    %67 = tpu.matmul %54, %66, %cst_49 {dimension_numbers = #tpu.dot_dimension_numbers<[1], [0], [0], [1], [0, 0, 1, 1], [], []>} : vector<16x16xf32>, vector<16x128xf32>, vector<16x128xf32> -> vector<16x128xf32>
    %68 = arith.mulf %63, %60 : vector<16x128xf32>
    %69 = math.roundeven %68 : vector<16x128xf32>
    %70 = arith.mulf %69, %58 : vector<16x128xf32>
    %71 = arith.mulf %65, %61 : vector<16x128xf32>
    %72 = math.roundeven %71 : vector<16x128xf32>
    %73 = arith.mulf %72, %59 : vector<16x128xf32>
    %74 = arith.mulf %67, %61 : vector<16x128xf32>
    %75 = math.roundeven %74 : vector<16x128xf32>
    %76 = arith.mulf %75, %59 : vector<16x128xf32>
    %cst_50 = arith.constant dense<0.000000e+00> : vector<16x128xf32>
    %77 = tpu.matmul %70, %56, %cst_50 {dimension_numbers = #tpu.dot_dimension_numbers<[1], [0], [0], [1], [0, 0, 1, 1], [], []>} : vector<16x128xf32>, vector<128x128xf32>, vector<16x128xf32> -> vector<16x128xf32>
    %cst_51 = arith.constant dense<0.000000e+00> : vector<16x128xf32>
    %78 = tpu.matmul %55, %77, %cst_51 {dimension_numbers = #tpu.dot_dimension_numbers<[1], [0], [0], [1], [0, 0, 1, 1], [], []>} : vector<16x16xf32>, vector<16x128xf32>, vector<16x128xf32> -> vector<16x128xf32>
    %cst_52 = arith.constant dense<0.000000e+00> : vector<16x128xf32>
    %79 = tpu.matmul %73, %56, %cst_52 {dimension_numbers = #tpu.dot_dimension_numbers<[1], [0], [0], [1], [0, 0, 1, 1], [], []>} : vector<16x128xf32>, vector<128x128xf32>, vector<16x128xf32> -> vector<16x128xf32>
    %cst_53 = arith.constant dense<0.000000e+00> : vector<16x128xf32>
    %80 = tpu.matmul %55, %79, %cst_53 {dimension_numbers = #tpu.dot_dimension_numbers<[1], [0], [0], [1], [0, 0, 1, 1], [], []>} : vector<16x16xf32>, vector<16x128xf32>, vector<16x128xf32> -> vector<16x128xf32>
    %cst_54 = arith.constant dense<0.000000e+00> : vector<16x128xf32>
    %81 = tpu.matmul %76, %56, %cst_54 {dimension_numbers = #tpu.dot_dimension_numbers<[1], [0], [0], [1], [0, 0, 1, 1], [], []>} : vector<16x128xf32>, vector<128x128xf32>, vector<16x128xf32> -> vector<16x128xf32>
    %cst_55 = arith.constant dense<0.000000e+00> : vector<16x128xf32>
    %82 = tpu.matmul %55, %81, %cst_55 {dimension_numbers = #tpu.dot_dimension_numbers<[1], [0], [0], [1], [0, 0, 1, 1], [], []>} : vector<16x16xf32>, vector<16x128xf32>, vector<16x128xf32> -> vector<16x128xf32>
    %cst_56 = arith.constant 1.40198755 : f32
    %83 = vector.broadcast %cst_56 : f32 to vector<16x128xf32>
    %84 = arith.mulf %83, %82 : vector<16x128xf32>
    %85 = arith.addf %78, %84 : vector<16x128xf32>
    %cst_57 = arith.constant 0.34411329 : f32
    %86 = vector.broadcast %cst_57 : f32 to vector<16x128xf32>
    %87 = arith.mulf %86, %80 : vector<16x128xf32>
    %88 = arith.subf %78, %87 : vector<16x128xf32>
    %cst_58 = arith.constant 0.714103818 : f32
    %89 = vector.broadcast %cst_58 : f32 to vector<16x128xf32>
    %90 = arith.mulf %89, %82 : vector<16x128xf32>
    %91 = arith.subf %88, %90 : vector<16x128xf32>
    %cst_59 = arith.constant 1.77197814 : f32
    %92 = vector.broadcast %cst_59 : f32 to vector<16x128xf32>
    %93 = arith.mulf %92, %80 : vector<16x128xf32>
    %94 = arith.addf %78, %93 : vector<16x128xf32>
    %cst_60 = arith.constant 0.00784313772 : f32
    %95 = vector.broadcast %cst_60 : f32 to vector<16x128xf32>
    %96 = arith.mulf %85, %95 : vector<16x128xf32>
    %cst_61 = arith.constant 1.000000e+00 : f32
    %97 = vector.broadcast %cst_61 : f32 to vector<16x128xf32>
    %98 = arith.subf %96, %97 : vector<16x128xf32>
    %cst_62 = arith.constant -1.000000e+00 : f32
    %cst_63 = arith.constant 1.000000e+00 : f32
    %99 = vector.broadcast %cst_62 : f32 to vector<16x128xf32>
    %100 = arith.maximumf %99, %98 : vector<16x128xf32>
    %101 = vector.broadcast %cst_63 : f32 to vector<16x128xf32>
    %102 = arith.minimumf %101, %100 : vector<16x128xf32>
    %c0_64 = arith.constant 0 : index
    %c0_65 = arith.constant 0 : index
    %c0_66 = arith.constant 0 : index
    %c0_67 = arith.constant 0 : index
    %103 = vector.load %arg10[%c0_64, %c0_65, %c0_66, %c0_67] : memref<1x3x16x128xf32, #tpu.memory_space<vmem>>, vector<1x1x16x128xf32>
    %104 = vector.shape_cast %103 : vector<1x1x16x128xf32> to vector<16x128xf32>
    %105 = vector.shape_cast %102 : vector<16x128xf32> to vector<1x1x16x128xf32>
    tpu.vector_store %arg10[%c0_64, %c0_65, %c0_66, %c0_67], %105 {strides = array<i32>} : memref<1x3x16x128xf32, #tpu.memory_space<vmem>>, vector<1x1x16x128xf32>,
    %cst_68 = arith.constant 0.00784313772 : f32
    %106 = vector.broadcast %cst_68 : f32 to vector<16x128xf32>
    %107 = arith.mulf %91, %106 : vector<16x128xf32>
    %cst_69 = arith.constant 1.000000e+00 : f32
    %108 = vector.broadcast %cst_69 : f32 to vector<16x128xf32>
    %109 = arith.subf %107, %108 : vector<16x128xf32>
    %cst_70 = arith.constant -1.000000e+00 : f32
    %cst_71 = arith.constant 1.000000e+00 : f32
    %110 = vector.broadcast %cst_70 : f32 to vector<16x128xf32>
    %111 = arith.maximumf %110, %109 : vector<16x128xf32>
    %112 = vector.broadcast %cst_71 : f32 to vector<16x128xf32>
    %113 = arith.minimumf %112, %111 : vector<16x128xf32>
    %c0_72 = arith.constant 0 : index
    %c1_73 = arith.constant 1 : index
    %c0_74 = arith.constant 0 : index
    %c0_75 = arith.constant 0 : index
    %114 = vector.load %arg10[%c0_72, %c1_73, %c0_74, %c0_75] : memref<1x3x16x128xf32, #tpu.memory_space<vmem>>, vector<1x1x16x128xf32>
    %115 = vector.shape_cast %114 : vector<1x1x16x128xf32> to vector<16x128xf32>
    %116 = vector.shape_cast %113 : vector<16x128xf32> to vector<1x1x16x128xf32>
    tpu.vector_store %arg10[%c0_72, %c1_73, %c0_74, %c0_75], %116 {strides = array<i32>} : memref<1x3x16x128xf32, #tpu.memory_space<vmem>>, vector<1x1x16x128xf32>,
    %cst_76 = arith.constant 0.00784313772 : f32
    %117 = vector.broadcast %cst_76 : f32 to vector<16x128xf32>
    %118 = arith.mulf %94, %117 : vector<16x128xf32>
    %cst_77 = arith.constant 1.000000e+00 : f32
    %119 = vector.broadcast %cst_77 : f32 to vector<16x128xf32>
    %120 = arith.subf %118, %119 : vector<16x128xf32>
    %cst_78 = arith.constant -1.000000e+00 : f32
    %cst_79 = arith.constant 1.000000e+00 : f32
    %121 = vector.broadcast %cst_78 : f32 to vector<16x128xf32>
    %122 = arith.maximumf %121, %120 : vector<16x128xf32>
    %123 = vector.broadcast %cst_79 : f32 to vector<16x128xf32>
    %124 = arith.minimumf %123, %122 : vector<16x128xf32>
    %c0_80 = arith.constant 0 : index
    %c2_81 = arith.constant 2 : index
    %c0_82 = arith.constant 0 : index
    %c0_83 = arith.constant 0 : index
    %125 = vector.load %arg10[%c0_80, %c2_81, %c0_82, %c0_83] : memref<1x3x16x128xf32, #tpu.memory_space<vmem>>, vector<1x1x16x128xf32>
    %126 = vector.shape_cast %125 : vector<1x1x16x128xf32> to vector<16x128xf32>
    %127 = vector.shape_cast %124 : vector<16x128xf32> to vector<1x1x16x128xf32>
    tpu.vector_store %arg10[%c0_80, %c2_81, %c0_82, %c0_83], %127 {strides = array<i32>} : memref<1x3x16x128xf32, #tpu.memory_space<vmem>>, vector<1x1x16x128xf32>,
    return
  }
  func.func @transform_0(%arg0: i32, %arg1: i32, %arg2: i32) -> (i32, i32, i32, i32) {
    %c0_i32 = arith.constant 0 : i32
    %c0_i32_0 = arith.constant 0 : i32
    return %arg0, %c0_i32, %arg1, %arg2 : i32, i32, i32, i32
  }
  func.func @transform_1(%arg0: i32, %arg1: i32, %arg2: i32) -> (i32, i32) {
    %c0_i32 = arith.constant 0 : i32
    %c0_i32_0 = arith.constant 0 : i32
    %c0_i32_1 = arith.constant 0 : i32
    return %c0_i32, %c0_i32_0 : i32, i32
  }
  func.func @transform_2(%arg0: i32, %arg1: i32, %arg2: i32) -> (i32, i32) {
    %c0_i32 = arith.constant 0 : i32
    %c0_i32_0 = arith.constant 0 : i32
    %c0_i32_1 = arith.constant 0 : i32
    return %c0_i32, %c0_i32_0 : i32, i32
  }
  func.func @transform_3(%arg0: i32, %arg1: i32, %arg2: i32) -> (i32, i32) {
    %c0_i32 = arith.constant 0 : i32
    %c0_i32_0 = arith.constant 0 : i32
    %c0_i32_1 = arith.constant 0 : i32
    return %c0_i32, %c0_i32_0 : i32, i32
  }
  func.func @transform_4(%arg0: i32, %arg1: i32, %arg2: i32) -> (i32, i32) {
    %c0_i32 = arith.constant 0 : i32
    %c0_i32_0 = arith.constant 0 : i32
    %c0_i32_1 = arith.constant 0 : i32
    return %c0_i32, %c0_i32_0 : i32, i32
  }
  func.func @transform_5(%arg0: i32, %arg1: i32, %arg2: i32) -> (i32, i32) {
    %c0_i32 = arith.constant 0 : i32
    %c0_i32_0 = arith.constant 0 : i32
    %c0_i32_1 = arith.constant 0 : i32
    return %c0_i32, %c0_i32_0 : i32, i32
  }
  func.func @transform_6(%arg0: i32, %arg1: i32, %arg2: i32) -> (i32, i32) {
    %c0_i32 = arith.constant 0 : i32
    %c0_i32_0 = arith.constant 0 : i32
    %c0_i32_1 = arith.constant 0 : i32
    return %c0_i32, %c0_i32_0 : i32, i32
  }
  func.func @transform_7(%arg0: i32, %arg1: i32, %arg2: i32) -> (i32, i32, i32, i32) {
    %c0_i32 = arith.constant 0 : i32
    %c0_i32_0 = arith.constant 0 : i32
    return %arg0, %c0_i32, %arg1, %arg2 : i32, i32, i32, i32
  }
}

</mosaic_0001>

<bundles_post_ra>
// kernel: tpu_custom_call.1
= control target key start
LH: loop header
LB: loop body
LE: loop exit
PB: predicated region body
PF: predicated region fallthrough
CT: control target
= control target key end

     0   :  { %s3390_s0 = inlined_call_operand.hbm [shape: f32[2,3,16,128], index: 0, kind: input, shape index: {}]   ;;  %s3391_s1 = inlined_call_operand.hbm [shape: f32[16,16], index: 1, kind: input, shape index: {}]   ;;  %s3392_s2 = inlined_call_operand.hbm [shape: f32[16,16], index: 2, kind: input, shape index: {}]   ;;  %s3393_s3 = inlined_call_operand.hbm [shape: f32[128,128], index: 3, kind: input, shape index: {}]   ;;  %s3394_s4 = inlined_call_operand.hbm [shape: f32[128,128], index: 4, kind: input, shape index: {}]   ;;  %s3395_s5 = inlined_call_operand.hbm [shape: f32[32,128], index: 5, kind: input, shape index: {}]   ;;  %s3396_s6 = inlined_call_operand.hbm [shape: f32[32,128], index: 6, kind: input, shape index: {}]   ;;  %s3397_s7 = inlined_call_operand.hbm [shape: f32[2,3,16,128], index: 7, kind: output, shape index: {}]  }
   0x1   :  { %3406 = sst [smem:[#allocation20_spill]] %s3391_s1 }
   0x2   :  { %3407 = sst [smem:[#allocation21_spill]] %s3392_s2 }
   0x3   :  { %3408 = sst [smem:[#allocation22_spill]] %s3397_s7 }
   0x4   :  { %12 = vsyncpa [#allocation3], 0 }
   0x5   :  { %14 = vsyncpa [#allocation3 + $0x1], 0 }
   0x6   :  { %15 = vsyncpa [#allocation6], 0 }
   0x7   :  { %16 = vsyncpa [#allocation9], 0 }
   0x8   :  { %17 = vsyncpa [#allocation12], 0 }
   0x9   :  { %18 = vsyncpa [#allocation4], 0 }
   0xa   :  { %20 = vsyncpa [#allocation4 + $0x1], 0  ;;  %s2809_s24 = smov 0   ;;  %s2811_s25 = smov 0  }
   0xb   :  { %s2813_s26 = smov 0   ;;  %s2815_s27 = smov 0  }
   0xc   :  { %s2817_s28 = smov 0   ;;  %s2819_s29 = smov 0  }
   0xd LB: > { %s3398_s30 = sadd.s32 4294967295, %s2755_s29   ;;  %p1669_p0 = scmp.ge.s32.totalorder %s2755_s29, 1  ;;  %s2755_s29 = sphi %s2819_s29, %s26_s29   ;;  %s2751_s28 = sphi %s2817_s28, %s3434_s28   ;;  %s2747_s27 = sphi %s2815_s27, %s3433_s27   ;;  %s2743_s26 = sphi %s2813_s26, %s3432_s26   ;;  %s2739_s25 = sphi %s2811_s25, %s3431_s25   ;;  %s2735_s24 = sphi %s2809_s24, %s3430_s24  }
   0xe   : > { %p2843_p1 = scmp.eq.s32.totalorder %s3398_s30, 0  ;;  %p236_p2 = scmp.lt.s32.totalorder %s2755_s29, 3 }
   0xf   : > { %s2757_s10 = smov [#allocation5]   ;;  %s2758_s13 = smov [#allocation8]  }
  0x10   : > { %s3409_s8 = scalar_select %p2843_p1, 1, 0 }
  0x11   : > { %p2848_p3 = pnand %p1669_p0, %p236_p2  ;;  %s248_s11 = sshll.u32 %s2757_s10, 4  ;;  %s2852_s11 = int_to_ptr.vmem [resolvable:$true] %s248_s11 }
  0x12   : > { %s274_s14 = sshll.u32 %s2758_s13, 4  ;;  %s2759_s15 = smov [#allocation11]   ;;  %s2863_s14 = int_to_ptr.vmem [resolvable:$true] %s274_s14 }
  0x13   : > { %s3410_s9 = scalar_select %p2848_p3, 1, 0 }
  0x14   : > { %p2364_p4 = pneg %p2848_p3  ;;  %s2865_s16 = sshll.u32 %s2759_s15, 4  ;;  %s301_s16 = int_to_ptr.vmem [resolvable:$true] %s2865_s16 }
  0x15   : > { %s3412_s1 = sld [smem:[#allocation20_spill]] }
  0x16   : > { %p2859_p6 = pnand %p2364_p4, %p2843_p1 }
  0x18   : > { %p2875_p8 = pneg %p2859_p6 }
  0x1b   : > { %s2463_s19 = scalar_lea.hbm %s3412_s1, 256 }
  0x1c   : > { %p2464_p7 = scmp.ne.s32.totalorder %s3412_s1, %s2463_s19  ;;  %p2470_p11 = scmp.lt.u32.totalorder %s2463_s19, %s3412_s1 }
  0x1e   : > { %p2466_p9 = pnand %p2875_p8, %p2464_p7 }
  0x20   : > { %p2467_p10 = pneg %p2466_p9 }
  0x22   : > { %p2472_p12 = pnand %p2470_p11, %p2467_p10 }
  0x24   : > { %2475 = shalt.err (!%p2472_p12)
}
  0x25   : > { %s2476_s13 = scalar_lea.vmem %s2852_s11, 256  ;;  %p2484_p4 = scmp.lt.s32.totalorder %s2852_s11, %s2852_s11 }
  0x26   : > { %p2477_p13 = scmp.ne.s32.totalorder %s2852_s11, %s2476_s13  ;;  %p2485_p5 = scmp.lt.s32.totalorder %s2476_s13, %s2476_s13 }
  0x28   : > { %p2479_p0 = pnand %p2477_p13, %p2875_p8  ;;  %p2486_p7 = por %p2485_p5, %p2484_p4 }
  0x2a   : > { %p2480_p2 = pneg %p2479_p0 }
  0x2c   : > { %p2487_p9 = pnand %p2486_p7, %p2480_p2 }
  0x2e   : > { %2490 = shalt.err (!%p2487_p9)
}
  0x2f   : > { %s3403_s15 = smov 128   ;;  %s3404_s17 = smov 8  }
  0x30   : > { %2367 = dma.hbm_to_vmem [thread:$0]  (!%p2859_p6), %s3412_s1, 256, %s2852_s11, [#allocation6], %s3403_s15, %s3403_s15, %s3404_s17  }
  0x31   : > { %s2491_s23 = scalar_lea.hbm %s3393_s3, 2048 }
  0x32   : > { %p2492_p5 = scmp.ne.s32.totalorder %s3393_s3, %s2491_s23  ;;  %p2498_p12 = scmp.lt.u32.totalorder %s2491_s23, %s3393_s3 }
  0x34   : > { %p2494_p10 = pnand %p2492_p5, %p2875_p8 }
  0x36   : > { %p2495_p11 = pneg %p2494_p10 }
  0x38   : > { %p2500_p13 = pnand %p2498_p12, %p2495_p11 }
  0x3a   : > { %2503 = shalt.err (!%p2500_p13)
}
  0x3b   : > { %s2504_s11 = scalar_lea.vmem %s2863_s14, 2048  ;;  %p2512_p7 = scmp.lt.s32.totalorder %s2863_s14, %s2863_s14 }
  0x3c   : > { %p2505_p0 = scmp.ne.s32.totalorder %s2863_s14, %s2504_s11  ;;  %p2513_p9 = scmp.lt.s32.totalorder %s2504_s11, %s2504_s11 }
  0x3e   : > { %p2507_p2 = pnand %p2505_p0, %p2875_p8  ;;  %p2514_p5 = por %p2513_p9, %p2512_p7 }
  0x40   : > { %p2508_p4 = pneg %p2507_p2 }
  0x42   : > { %p2515_p10 = pnand %p2514_p5, %p2508_p4 }
  0x44   : > { %2518 = shalt.err (!%p2515_p10)
}
  0x45   : > { %2373 = dma.hbm_to_vmem [thread:$0]  (!%p2859_p6), %s3393_s3, 2048, %s2863_s14, [#allocation9], %s3403_s15, %s3403_s15, %s3404_s17  }
  0x46   : > { %s2519_s20 = scalar_lea.hbm %s3395_s5, 512 }
  0x47   : > { %p2520_p11 = scmp.ne.s32.totalorder %s3395_s5, %s2519_s20  ;;  %p2526_p0 = scmp.lt.u32.totalorder %s2519_s20, %s3395_s5 }
  0x49   : > { %p2522_p12 = pnand %p2520_p11, %p2875_p8 }
  0x4b   : > { %p2523_p13 = pneg %p2522_p12 }
  0x4d   : > { %p2528_p2 = pnand %p2526_p0, %p2523_p13 }
  0x4f   : > { %2531 = shalt.err (!%p2528_p2)
}
  0x50   : > { %s2532_s11 = scalar_lea.vmem %s301_s16, 512  ;;  %p2540_p5 = scmp.lt.s32.totalorder %s301_s16, %s301_s16 }
  0x51   : > { %p2533_p4 = scmp.ne.s32.totalorder %s301_s16, %s2532_s11  ;;  %p2541_p10 = scmp.lt.s32.totalorder %s2532_s11, %s2532_s11 }
  0x53   : > { %p2535_p7 = pnand %p2533_p4, %p2875_p8  ;;  %p2542_p3 = por %p2541_p10, %p2540_p5 }
  0x55   : > { %p2536_p9 = pneg %p2535_p7 }
  0x57   : > { %p2543_p1 = pnand %p2542_p3, %p2536_p9 }
  0x59   : > { %2546 = shalt.err (!%p2543_p1)
}
  0x5a   : > { %2379 = dma.hbm_to_vmem [thread:$0]  (!%p2859_p6), %s3395_s5, 512, %s301_s16, [#allocation12], %s3403_s15, %s3403_s15, %s3404_s17  }
  0x5b   : > { %s2762_s30 = smov [#allocation7]   ;;  %s2763_s19 = smov [#allocation10]  }
  0x5c   : > { %s261_s18 = sshll.u32 %s2762_s30, 4  ;;  %s287_s20 = sshll.u32 %s2763_s19, 4  ;;  %s262_s18 = int_to_ptr.vmem [resolvable:$true] %s261_s18  ;;  %s288_s20 = int_to_ptr.vmem [resolvable:$true] %s287_s20 }
  0x5d   : > { %s3414_s2 = sld [smem:[#allocation21_spill]] }
  0x63   : > { %s2547_s10 = scalar_lea.hbm %s3414_s2, 256 }
  0x64   : > { %p2548_p1 = scmp.ne.s32.totalorder %s3414_s2, %s2547_s10  ;;  %p2554_p12 = scmp.lt.u32.totalorder %s2547_s10, %s3414_s2 }
  0x66   : > { %p2550_p3 = pnand %p2548_p1, %p2875_p8 }
  0x68   : > { %p2551_p11 = pneg %p2550_p3 }
  0x6a   : > { %p2556_p13 = pnand %p2554_p12, %p2551_p11 }
  0x6c   : > { %2559 = shalt.err (!%p2556_p13)
}
  0x6d   : > { %s2560_s16 = scalar_lea.vmem %s262_s18, 256  ;;  %p2568_p7 = scmp.lt.s32.totalorder %s262_s18, %s262_s18 }
  0x6e   : > { %p2561_p0 = scmp.ne.s32.totalorder %s262_s18, %s2560_s16  ;;  %p2569_p9 = scmp.lt.s32.totalorder %s2560_s16, %s2560_s16 }
  0x70   : > { %p2563_p2 = pnand %p2561_p0, %p2875_p8  ;;  %p2570_p5 = por %p2569_p9, %p2568_p7 }
  0x72   : > { %p2564_p4 = pneg %p2563_p2 }
  0x74   : > { %p2571_p10 = pnand %p2570_p5, %p2564_p4 }
  0x76   : > { %2574 = shalt.err (!%p2571_p10)
}
  0x77   : > { %2370 = dma.hbm_to_vmem [thread:$0]  (!%p2859_p6), %s3414_s2, 256, %s262_s18, [#allocation6], %s3403_s15, %s3403_s15, %s3404_s17  }
  0x78   : > { %s2575_s21 = scalar_lea.hbm %s3394_s4, 2048 }
  0x79   : > { %p2576_p1 = scmp.ne.s32.totalorder %s3394_s4, %s2575_s21  ;;  %p2582_p12 = scmp.lt.u32.totalorder %s2575_s21, %s3394_s4 }
  0x7b   : > { %p2578_p3 = pnand %p2576_p1, %p2875_p8 }
  0x7d   : > { %p2579_p11 = pneg %p2578_p3 }
  0x7f   : > { %p2584_p13 = pnand %p2582_p12, %p2579_p11 }
  0x81   : > { %2587 = shalt.err (!%p2584_p13)
}
  0x82   : > { %s2588_s14 = scalar_lea.vmem %s288_s20, 2048  ;;  %p2596_p7 = scmp.lt.s32.totalorder %s288_s20, %s288_s20 }
  0x83   : > { %p2589_p0 = scmp.ne.s32.totalorder %s288_s20, %s2588_s14  ;;  %p2597_p9 = scmp.lt.s32.totalorder %s2588_s14, %s2588_s14 }
  0x85   : > { %p2591_p2 = pnand %p2589_p0, %p2875_p8  ;;  %p2598_p5 = por %p2597_p9, %p2596_p7 }
  0x87   : > { %p2592_p4 = pneg %p2591_p2 }
  0x89   : > { %p2599_p10 = pnand %p2598_p5, %p2592_p4 }
  0x8b   : > { %2602 = shalt.err (!%p2599_p10)
}
  0x8c   : > { %2376 = dma.hbm_to_vmem [thread:$0]  (!%p2859_p6), %s3394_s4, 2048, %s288_s20, [#allocation9], %s3403_s15, %s3403_s15, %s3404_s17  }
  0x8d   : > { %s2764_s1 = smov [#allocation13]   ;;  %s2603_s21 = scalar_lea.hbm %s3396_s6, 512 }
  0x8e   : > { %s313_s7 = sshll.u32 %s2764_s1, 4  ;;  %p2604_p1 = scmp.ne.s32.totalorder %s3396_s6, %s2603_s21  ;;  %s314_s7 = int_to_ptr.vmem [resolvable:$true] %s313_s7 }
  0x8f   : > { %p2610_p12 = scmp.lt.u32.totalorder %s2603_s21, %s3396_s6 }
  0x90   : > { %p2606_p3 = pnand %p2604_p1, %p2875_p8 }
  0x92   : > { %p2607_p11 = pneg %p2606_p3 }
  0x94   : > { %p2612_p13 = pnand %p2610_p12, %p2607_p11 }
  0x96   : > { %2615 = shalt.err (!%p2612_p13)
}
  0x97   : > { %s2616_s20 = scalar_lea.vmem %s314_s7, 512  ;;  %p2624_p7 = scmp.lt.s32.totalorder %s314_s7, %s314_s7 }
  0x98   : > { %p2617_p0 = scmp.ne.s32.totalorder %s314_s7, %s2616_s20  ;;  %p2625_p9 = scmp.lt.s32.totalorder %s2616_s20, %s2616_s20 }
  0x9a   : > { %p2619_p2 = pnand %p2617_p0, %p2875_p8  ;;  %p2626_p5 = por %p2625_p9, %p2624_p7 }
  0x9c   : > { %p2620_p4 = pneg %p2619_p2 }
  0x9e   : > { %p2627_p10 = pnand %p2626_p5, %p2620_p4 }
  0xa0   : > { %2630 = shalt.err (!%p2627_p10)
}
  0xa1   : > { %2382 = dma.hbm_to_vmem [thread:$0]  (!%p2859_p6), %s3396_s6, 512, %s314_s7, [#allocation12], %s3403_s15, %s3403_s15, %s3404_s17  }
  0xa2   : > { %s1668_s12 = sadd.s32 4294967294, %s2755_s29   ;;  %s45_s22 = sadd.s32 1, %s2751_s28 }
  0xa3   : > { %p47_p8 = scmp.ge.s32.totalorder %s45_s22, 2  ;;  %s56_s16 = sadd.s32 1, %s2743_s26 }
  0xa4   : > { %p63_p1 = scmp.ne.s32.totalorder %s2743_s26, %s2739_s25  ;;  %p64_p3 = scmp.eq.s32.totalorder %s2755_s29, 0 }
  0xa5   : > { %s3436_s22 = smov (%p47_p8, %s45_s22), 0  ;;  %p69_p12 = scmp.ne.s32.totalorder %s2739_s25, %s2735_s24 }
  0xa6   : > { %p3018_p11 = por %p64_p3, %p63_p1  ;;  %s49_s7 = ssub.s32 %s2751_s28, %s3436_s22 }
  0xa7   : > { %s3416_s30 = sadd.s32 4294967295, %s2755_s29   ;;  %p54_p13 = scmp.eq.s32.totalorder %s49_s7, 0 }
  0xa8   : > { %p223_p6 = scmp.eq.s32.totalorder %s3416_s30, 1  ;;  %p3417_p0 = scmp.ne.s32.totalorder %s3409_s8, 0 }
  0xa9   : > { %p229_p7 = scmp.eq.s32.totalorder %s1668_s12, 1  ;;  %p2397_p5 = scmp.lt.s32.totalorder %s2755_s29, 2 }
  0xaa   : > { %p3030_p2 = por %p3417_p0, %p69_p12  ;;  %p3034_p4 = por %p223_p6, %p63_p1 }
  0xab   : > { %s3039_s23 = scalar_select %p54_p13, %s2743_s26, %s56_s16  }
  0xac   : > { %s3419_s21 = scalar_select %p3034_p4, 1, 0 }
  0xad   : > { %p3041_p9 = por %p229_p7, %p69_p12  ;;  %s327_s13 = sand.u32 1, %s2743_s26  }
  0xae   : > { %s2327_s11 = smul.u32 768, %s2751_s28  ;;  %p3050_p10 = pnand %p2397_p5, %p3018_p11 }
  0xaf   : > { %s3420_s10 = scalar_select %p3041_p9, 1, 0 }
  0xb0   : > { %s2326_s20 = smul.u32 48, %s327_s13  ;;  %s3057_s12 = scalar_lea.hbm %s3390_s0, %s2327_s11 }
  0xb1   : > { %s3061_s1 = scalar_lea.sflag [#allocation3], %s327_s13  ;;  %s2631_s15 = scalar_lea.hbm %s3057_s12, 768 }
  0xb2   : > { %s331_s16 = scalar_lea.vmem [#allocation2], %s2326_s20  ;;  %p2632_p8 = scmp.ne.s32.totalorder %s3057_s12, %s2631_s15 }
  0xb3   : > { %s341_s30 = sshll.u32 %s331_s16, 4  ;;  %p2633_p1 = pneg %p3050_p10  ;;  %s3059_s30 = int_to_ptr.vmem [resolvable:$true] %s341_s30 }
  0xb4   : > { %s2636_s7 = scalar_lea.hbm %s3390_s0, 1536  ;;  %p2637_p12 = scmp.lt.u32.totalorder %s3057_s12, %s3390_s0 }
  0xb5   : > { %p2634_p3 = pnand %p2633_p1, %p2632_p8  ;;  %p2638_p6 = scmp.lt.u32.totalorder %s2636_s7, %s2631_s15 }
  0xb6   : > { %p2640_p0 = scmp.lt.u32.totalorder %s2631_s15, %s3057_s12 }
  0xb7   : > { %p2635_p11 = pneg %p2634_p3  ;;  %p2639_p13 = por %p2638_p6, %p2637_p12 }
  0xb9   : > { %p2641_p7 = por %p2640_p0, %p2639_p13 }
  0xbb   : > { %p2642_p5 = pnand %p2641_p7, %p2635_p11 }
  0xbd   : > { %2645 = shalt.err (!%p2642_p5)
}
  0xbe   : > { %s2646_s13 = scalar_lea.vmem %s3059_s30, 768  ;;  %s2765_s20 = smov [#allocation2]  }
  0xbf   : > { %p2647_p8 = scmp.ne.s32.totalorder %s3059_s30, %s2646_s13  ;;  %s2651_s16 = sshll.u32 %s2765_s20, 4  ;;  %s2652_s16 = int_to_ptr.vmem [resolvable:$false] %s2651_s16 }
  0xc0   : > { %s2653_s2 = scalar_lea.vmem %s2652_s16, 1536  ;;  %p2654_p4 = scmp.lt.s32.totalorder %s3059_s30, %s2652_s16 }
  0xc1   : > { %p2649_p3 = pnand %p2647_p8, %p2633_p1  ;;  %p2655_p12 = scmp.lt.s32.totalorder %s2653_s2, %s2646_s13 }
  0xc3   : > { %p2650_p9 = pneg %p2649_p3  ;;  %p2656_p6 = por %p2655_p12, %p2654_p4 }
  0xc5   : > { %p2657_p13 = pnand %p2656_p6, %p2650_p9 }
  0xc7   : > { %2660 = shalt.err (!%p2657_p13)
}
  0xc8   : > { %s3422_s15 = smov 8   ;;  %s3423_s17 = smov 128  }
  0xc9   : > { %2386 = dma.hbm_to_vmem [thread:$0]  (!%p3050_p10), %s3057_s12, 768, %s3059_s30, %s3061_s1, %s3423_s17, %s3423_s17, %s3422_s15  }
  0xca   : > { %p3424_p1 = scmp.ne.s32.totalorder %s3410_s9, 0 }
  0xcb   : > { %s3095_s11 = sand.u32 (!%p3424_p1), 1, %s2739_s25  }
  0xcc   : > { %353 = sbr.rel (%p3424_p1) target bundleno = 1966 (0x7ae), region = 48  ;;  %s356_s7 = scalar_lea.sflag (!%p3424_p1), [#allocation3], %s3095_s11 }
  0xcd   : > { %s2328_s18 = smul.u32 (!%p3424_p1), 48, %s3095_s11 }
  0xcf   : > { %s3101_s14 = scalar_lea.vmem (!%p3424_p1), [#allocation2], %s2328_s18 }
  0xd3   : > { %2714 = dma.done.wait (%p3030_p2), %s356_s7, 768  }
  0xd4   : > { %2716 = vsyncadd (%p3030_p2), %s356_s7, 4294966528  ;;  %p3425_p4 = scmp.ne.s32.totalorder %s3409_s8, 0 }
  0xd6   : > { %2718 = dma.done.wait (%p3425_p4), [#allocation6], 512  }
  0xd7   : > { %2720 = vsyncadd (%p3425_p4), [#allocation6], 4294966784 }
  0xd8   : > { %2722 = dma.done.wait (%p3425_p4), [#allocation9], 4096  }
  0xd9   : > { %2724 = vsyncadd (%p3425_p4), [#allocation9], 4294963200 }
  0xda   : > { %2726 = dma.done.wait (%p3425_p4), [#allocation12], 1024  }
  0xdb   : > { %2728 = vsyncadd (%p3425_p4), [#allocation12], 4294966272  ;;  %v498_v0 = vld [vmem:[#allocation10] sm:$0xff]  ;;  %v499_v1 = vld [vmem:[#allocation10 + $0x8] sm:$0xff]  ;;  %vm597_vm0 = vcmask 130048   ;;  %s3322_s8 = scalar_lea.vmem [#allocation14], %s2328_s18 }
  0xdc   : > { %v500_v2 = vld [vmem:[#allocation10 + $0x10] sm:$0xff]  ;;  %v3119_v3 = vpack.c.bf16 %v499_v1, %v498_v0  ;;  %v501_v4 = vld [vmem:[#allocation10 + $0x18] sm:$0xff]  ;;  %v502_v6 = vld [vmem:[#allocation10 + $0x20] sm:$0xff]  ;;  %s1518_s9 = sshll.u32 %s3322_s8, 4  ;;  %s2335_s19 = smul.u32 768, %s2747_s27  ;;  %s3332_s9 = int_to_ptr.vmem [resolvable:$true] %s1518_s9 }
  0xdd   : > { %v3121_v5 = vpack.c.bf16 %v501_v4, %v500_v2  ;;  %v503_v7 = vld [vmem:[#allocation10 + $0x28] sm:$0xff]  ;;  %v416_v9 = vld [vmem:[%s3101_s14] sm:$0xff]  ;;  %v1687_v10 = vld [vmem:[%s3101_s14 + $0x10] sm:$0xff]  ;;  %s3426_s1 = sld [smem:[#allocation22_spill]]  ;;  %s1502_s27 = scalar_lea.sflag [#allocation4], %s3095_s11 }
  0xde   : > { %2111 = vmatprep.subr.bf16.mxu0 %v3119_v3  ;;  %v3126_v8 = vpack.c.bf16 %v503_v7, %v502_v6  ;;  %v504_v11 = vld [vmem:[#allocation10 + $0x30] sm:$0xff]  ;;  %v505_v12 = vld [vmem:[#allocation10 + $0x38] sm:$0xff]  ;;  %v1685_v13 = vclamps-f32 %v416_v9, 1.0  ;;  %v1689_v14 = vclamps-f32 %v1687_v10, 1.0  ;;  %v506_v23 = vld [vmem:[#allocation10 + $0x40] sm:$0xff]  ;;  %s2661_s20 = scalar_lea.vmem %s3332_s9, 768 }
  0xdf   : > { %2113 = vmatpush3.bf16.msra.mxu0 %v3119_v3  ;;  %v1691_v15 = vld [vmem:[%s3101_s14 + $0x20] sm:$0xff]  ;;  %v417_v19 = vld [vmem:[%s3101_s14 + $0x8] sm:$0xff]  ;;  %v1688_v20 = vld [vmem:[%s3101_s14 + $0x18] sm:$0xff]  ;;  %v3135_v21 = vpack.c.bf16 %v505_v12, %v504_v11  ;;  %p2662_p2 = scmp.ne.s32.totalorder %s3332_s9, %s2661_s20  ;;  %p3427_p9 = scmp.ne.s32.totalorder %s3419_s21, 0 }
  0xe0   : > { %2115 = vmatprep.subr.bf16.mxu0 %v3121_v5  ;;  %v1693_v16 = vclamps-f32 %v1691_v15, 1.0  ;;  %v422_v17 = vadd.f32 1.0, %v1685_v13  ;;  %v433_v18 = vadd.f32 1.0, %v1689_v14  ;;  %v507_v24 = vld [vmem:[#allocation10 + $0x48] sm:$0xff]  ;;  %v1686_v28 = vclamps-f32 %v417_v19, 1.0  ;;  %v508_v35 = vld [vmem:[#allocation10 + $0x50] sm:$0xff] }
  0xe1   : > { %v1690_v29 = vclamps-f32 %v1688_v20, 1.0  ;;  %v1692_v32 = vld [vmem:[%s3101_s14 + $0x28] sm:$0xff]  ;;  %v3148_v33 = vpack.c.bf16 %v507_v24, %v506_v23  ;;  %v510_v43 = vld [vmem:[#allocation10 + $0x60] sm:$0xff]  ;;  %v512_v49 = vld [vmem:[#allocation10 + $0x70] sm:$0xff]  ;;  %p2663_p10 = pnand %p2662_p2, %p3427_p9  ;;  %s2766_s16 = smov [#allocation14]  }
  0xe2   : > { %v444_v22 = vadd.f32 1.0, %v1693_v16  ;;  %v3137_v25 = vmul.f32 127.5, %v422_v17  ;;  %v3139_v26 = vmul.f32 127.5, %v433_v18  ;;  %v509_v36 = vld [vmem:[#allocation10 + $0x58] sm:$0xff]  ;;  %v423_v38 = vadd.f32 1.0, %v1686_v28  ;;  %v511_v44 = vld [vmem:[#allocation10 + $0x68] sm:$0xff] }
  0xe3   : > { %2117 = vmatpush3.bf16.msra.mxu0 %v3121_v5  ;;  %v434_v39 = vadd.f32 1.0, %v1690_v29  ;;  %v1694_v40 = vclamps-f32 %v1692_v32, 1.0  ;;  %v3153_v42 = vpack.c.bf16 %v509_v36, %v508_v35  ;;  %v3161_v48 = vpack.c.bf16 %v511_v44, %v510_v43  ;;  %v513_v50 = vld [vmem:[#allocation10 + $0x78] sm:$0xff]  ;;  %v478_v58 = vld [vmem:[#allocation5] sm:$0xff]  ;;  %v3180_v2 = vld [vmem:[#allocation5 + $0x8] sm:$0xff]  ;;  %s3337_s13 = scalar_lea.hbm %s3426_s1, %s2335_s19  ;;  %p2664_p11 = pneg %p2663_p10 }
  0xe4   : > { %2119 = vmatprep.subr.bf16.mxu0 %v3126_v8  ;;  %v3141_v27 = vmul.f32 127.5, %v444_v22  ;;  %v448_v30 = vmul.f32 0.299, %v3137_v25  ;;  %v450_v31 = vmul.f32 0.587, %v3139_v26  ;;  %v3155_v45 = vmul.f32 127.5, %v423_v38  ;;  %1897 = vmatprep.mubr.msk.f32.mxu1 %vm597_vm0, %v478_v58 }
  0xe5   : > { %v3157_v46 = vmul.f32 127.5, %v434_v39  ;;  %v445_v47 = vadd.f32 1.0, %v1694_v40  ;;  %v3169_v54 = vpack.c.bf16 %v513_v50, %v512_v49  ;;  %v458_v59 = vmul.f32 -0.1687, %v3137_v25  ;;  %v482_v28 = vld [vmem:[#allocation8] sm:$0xff]  ;;  %v483_v29 = vld [vmem:[#allocation8 + $0x8] sm:$0xff] }
  0xe6   : > { %v454_v34 = vmul.f32 0.114, %v3141_v27  ;;  %v452_v37 = vadd.f32 %v450_v31, %v448_v30  ;;  %v449_v52 = vmul.f32 0.299, %v3155_v45  ;;  %v460_v60 = vmul.f32 0.3313, %v3139_v26 }
  0xe7   : > { %2121 = vmatpush3.bf16.msra.mxu0 %v3126_v8  ;;  %v3163_v51 = vmul.f32 127.5, %v445_v47  ;;  %v451_v53 = vmul.f32 0.587, %v3157_v46  ;;  %v464_v0 = vmul.f32 0.5, %v3141_v27  ;;  %v459_v6 = vmul.f32 -0.1687, %v3155_v45 }
  0xe8   : > { %2123 = vmatprep.subr.bf16.mxu0 %v3135_v21  ;;  %v456_v41 = vadd.f32 %v454_v34, %v452_v37  ;;  %v462_v63 = vsub.f32 %v458_v59, %v460_v60  ;;  %v461_v7 = vmul.f32 0.3313, %v3157_v46  ;;  %v468_v14 = vmul.f32 0.5, %v3137_v25  ;;  %v484_v35 = vld [vmem:[#allocation8 + $0x10] sm:$0xff]  ;;  %v485_v36 = vld [vmem:[#allocation8 + $0x18] sm:$0xff]  ;;  %v514_v37 = vld [vmem:[#allocation11] sm:$0xff] }
  0xe9   : > { %v453_v55 = vadd.f32 %v451_v53, %v449_v52  ;;  %v455_v56 = vmul.f32 0.114, %v3163_v51  ;;  %v465_v10 = vmul.f32 0.5, %v3163_v51  ;;  %v470_v15 = vmul.f32 0.4187, %v3139_v26  ;;  %v518_v26 = vld [vmem:[#allocation13] sm:$0xff] }
  0xea   : > { %1890 = vmatprep.mubr.f32.mxu0 %v456_v41  ;;  %v466_v4 = vadd.f32 %v464_v0, %v462_v63  ;;  %v463_v9 = vsub.f32 %v459_v6, %v461_v7  ;;  %v474_v19 = vmul.f32 0.0813, %v3141_v27  ;;  %v471_v23 = vmul.f32 0.4187, %v3157_v46  ;;  %v486_v40 = vld [vmem:[#allocation8 + $0x20] sm:$0xff]  ;;  %v487_v41 = vld [vmem:[#allocation8 + $0x28] sm:$0xff] }
  0xeb   : > { %2125 = vmatpush3.bf16.msra.mxu0 %v3135_v21  ;;  %v457_v57 = vadd.f32 %v455_v56, %v453_v55  ;;  %v472_v18 = vsub.f32 %v468_v14, %v470_v15  ;;  %v3237_v38 = vpack.c.bf16 %v485_v36, %v484_v35  ;;  %v488_v43 = vld [vmem:[#allocation8 + $0x30] sm:$0xff]  ;;  %v489_v44 = vld [vmem:[#allocation8 + $0x38] sm:$0xff]  ;;  %v490_v46 = vld [vmem:[#allocation8 + $0x40] sm:$0xff]  ;;  %s2665_s2 = sshll.u32 %s2766_s16, 4  ;;  %s2666_s2 = int_to_ptr.vmem [resolvable:$false] %s2665_s2 }
  0xec   : > { %2127 = vmatprep.subr.bf16.mxu0 %v3148_v33  ;;  %v467_v11 = vadd.f32 %v465_v10, %v463_v9  ;;  %v491_v47 = vld [vmem:[#allocation8 + $0x48] sm:$0xff]  ;;  %v492_v49 = vld [vmem:[#allocation8 + $0x50] sm:$0xff]  ;;  %v493_v50 = vld [vmem:[#allocation8 + $0x58] sm:$0xff]  ;;  %s2667_s15 = scalar_lea.vmem %s2666_s2, 1536  ;;  %p2668_p0 = scmp.lt.s32.totalorder %s3332_s9, %s2666_s2 }
  0xed   : > { %v476_v22 = vsub.f32 %v472_v18, %v474_v19  ;;  %v494_v52 = vld [vmem:[#allocation8 + $0x60] sm:$0xff]  ;;  %v495_v53 = vld [vmem:[#allocation8 + $0x68] sm:$0xff]  ;;  %v496_v56 = vld [vmem:[#allocation8 + $0x70] sm:$0xff]  ;;  %p2669_p7 = scmp.lt.s32.totalorder %s2667_s15, %s2661_s20 }
  0xee   : > { %v519_v55 = vld [vmem:[#allocation13 + $0x8] sm:$0xff]  ;;  %v480_v63 = vld [vmem:[#allocation7] sm:$0xff]  ;;  %v521_v14 = vld [vmem:[#allocation13 + $0x18] sm:$0xff] }
  0xef   : > { %2129 = vmatpush3.bf16.msra.mxu0 %v3148_v33  ;;  %p2670_p5 = por %p2669_p7, %p2668_p0 }
  0xf0   : > { %2131 = vmatprep.subr.bf16.mxu0 %v3153_v42 }
  0xf1   : > { %p2671_p8 = pnand %p2670_p5, %p2664_p11 }
  0xf3   : > { %2133 = vmatpush3.bf16.msra.mxu0 %v3153_v42 }
  0xf4   : > { %2135 = vmatprep.subr.bf16.mxu0 %v3161_v48 }
  0xf7   : > { %2137 = vmatpush3.bf16.msra.mxu0 %v3161_v48 }
  0xf8   : > { %2139 = vmatprep.subr.bf16.mxu0 %v3169_v54 }
  0xfb   : > { %2141 = vmatpush3.bf16.msra.mxu0 %v3169_v54 }
  0xfe   : > { %1891 = vmatmul.mubr.f32.vlgmr.msra.gmra.mrb[0].mxu0 %v457_v57  ;;  %v497_v57 = vld [vmem:[#allocation8 + $0x78] sm:$0xff] }
  0xff   : > { %1939 = vmatprep.mubr.msk.f32.mxu0 %vm597_vm0, %v478_v58  ;;  %v3264_v59 = vpack.c.bf16 %v497_v57, %v496_v56 }
 0x1d1   : > { %v1892_v61 = vpop.f32.mrb[0].mxu0 }
 0x1d2   : > { %v588_v62 = vpop.f32.mrb[1].mxu0 }
 0x1d3   : > { %v2142_v1 = vpack.c.bf16 %v1892_v61, %v588_v62  ;;  %v515_v61 = vld [vmem:[#allocation11 + $0x8] sm:$0xff] }
 0x1d5   : > { %2143 = vmatprep.subr.bf16.mxu1 %v2142_v1 }
 0x1d6   : > { %2145 = vmatpush3.bf16.msra.mxu1 %v2142_v1 }
 0x1d7   : > { %2147 = vmatprep.subr.bf16.mxu1 %v3119_v3 }
 0x1d9   : > { %1898 = vmatmul.mubr.msk.f32.vlgmr.msra.gmra.mrb[0].mxu1 %vm597_vm0, %v3180_v2 }
 0x1da   : > { %2149 = vmatpush3.bf16.msra.mxu1 %v3119_v3  ;;  %1932 = vmatprep.mubr.f32.mxu1 %v466_v4 }
 0x1db   : > { %2151 = vmatprep.subr.bf16.mxu1 %v3121_v5 }
 0x1de   : > { %2153 = vmatpush3.bf16.msra.mxu1 %v3121_v5 }
 0x1df   : > { %2155 = vmatprep.subr.bf16.mxu1 %v3126_v8 }
 0x1e2   : > { %2157 = vmatpush3.bf16.msra.mxu1 %v3126_v8 }
 0x1e3   : > { %2159 = vmatprep.subr.bf16.mxu1 %v3135_v21 }
 0x1e6   : > { %2161 = vmatpush3.bf16.msra.mxu1 %v3135_v21 }
 0x1e7   : > { %2163 = vmatprep.subr.bf16.mxu1 %v3148_v33 }
 0x1ea   : > { %2165 = vmatpush3.bf16.msra.mxu1 %v3148_v33 }
 0x1eb   : > { %2167 = vmatprep.subr.bf16.mxu1 %v3153_v42 }
 0x1ee   : > { %2169 = vmatpush3.bf16.msra.mxu1 %v3153_v42 }
 0x1ef   : > { %2171 = vmatprep.subr.bf16.mxu1 %v3161_v48 }
 0x1f2   : > { %2173 = vmatpush3.bf16.msra.mxu1 %v3161_v48 }
 0x1f3   : > { %2175 = vmatprep.subr.bf16.mxu1 %v3169_v54 }
 0x1f6   : > { %2177 = vmatpush3.bf16.msra.mxu1 %v3169_v54 }
 0x1f9   : > { %1933 = vmatmul.mubr.f32.vlgmr.msra.gmra.mrb[2].mxu1 %v467_v11  ;;  %v516_v11 = vld [vmem:[#allocation11 + $0x10] sm:$0xff] }
 0x1fa   : > { %1981 = vmatprep.mubr.msk.f32.mxu1 %vm597_vm0, %v478_v58 }
 0x2ac   : > { %v3204_v12 = vpop.f32.mrb[0].mxu1 }
 0x2ad   : > { %v670_v13 = vpop.f32.mrb[1].mxu1  ;;  %v980_v58 = vmul.f32 %v3204_v12, %v519_v55  ;;  %v3272_v12 = vld [vmem:[#allocation7 + $0x8] sm:$0xff] }
 0x2ae   : > { %v979_v27 = vmul.f32 %v670_v13, %v518_v26 }
 0x2af   : > { %v2330_v60 = vround.rtne.f32 %v980_v58 }
 0x2b0   : > { %v2329_v34 = vround.rtne.f32 %v979_v27 }
 0x2b1   : > { %v984_v62 = vmul.f32 %v2330_v60, %v515_v61 }
 0x2b2   : > { %v983_v39 = vmul.f32 %v2329_v34, %v514_v37 }
 0x2cc   : > { %v1934_v16 = vpop.f32.mrb[2].mxu1 }
 0x2cd   : > { %v745_v17 = vpop.f32.mrb[3].mxu1 }
 0x2ce   : > { %v2178_v20 = vpack.c.bf16 %v1934_v16, %v745_v17  ;;  %v517_v17 = vld [vmem:[#allocation11 + $0x18] sm:$0xff] }
 0x2d0   : > { %2179 = vmatprep.subr.bf16.mxu0 %v2178_v20 }
 0x2d1   : > { %2181 = vmatpush3.bf16.msra.mxu0 %v2178_v20 }
 0x2d2   : > { %2183 = vmatprep.subr.bf16.mxu0 %v3119_v3 }
 0x2d4   : > { %1940 = vmatmul.mubr.msk.f32.vlgmr.msra.gmra.mrb[2].mxu0 %vm597_vm0, %v3180_v2 }
 0x2d5   : > { %2185 = vmatpush3.bf16.msra.mxu0 %v3119_v3  ;;  %1974 = vmatprep.mubr.f32.mxu0 %v476_v22  ;;  %v469_v3 = vmul.f32 0.5, %v3155_v45  ;;  %v3247_v45 = vpack.c.bf16 %v489_v44, %v488_v43 }
 0x2d6   : > { %2187 = vmatprep.subr.bf16.mxu0 %v3121_v5 }
 0x2d9   : > { %2189 = vmatpush3.bf16.msra.mxu0 %v3121_v5  ;;  %v473_v5 = vsub.f32 %v469_v3, %v471_v23 }
 0x2da   : > { %2191 = vmatprep.subr.bf16.mxu0 %v3126_v8 }
 0x2dd   : > { %2193 = vmatpush3.bf16.msra.mxu0 %v3126_v8  ;;  %v475_v8 = vmul.f32 0.0813, %v3163_v51  ;;  %v3255_v51 = vpack.c.bf16 %v493_v50, %v492_v49 }
 0x2de   : > { %2195 = vmatprep.subr.bf16.mxu0 %v3135_v21 }
 0x2e1   : > { %2197 = vmatpush3.bf16.msra.mxu0 %v3135_v21  ;;  %v477_v21 = vsub.f32 %v473_v5, %v475_v8 }
 0x2e2   : > { %2199 = vmatprep.subr.bf16.mxu0 %v3148_v33 }
 0x2e5   : > { %2201 = vmatpush3.bf16.msra.mxu0 %v3148_v33  ;;  %v3234_v33 = vpack.c.bf16 %v483_v29, %v482_v28 }
 0x2e6   : > { %2203 = vmatprep.subr.bf16.mxu0 %v3153_v42 }
 0x2e9   : > { %2205 = vmatpush3.bf16.msra.mxu0 %v3153_v42  ;;  %v3243_v42 = vpack.c.bf16 %v487_v41, %v486_v40 }
 0x2ea   : > { %2207 = vmatprep.subr.bf16.mxu0 %v3161_v48 }
 0x2ed   : > { %2209 = vmatpush3.bf16.msra.mxu0 %v3161_v48  ;;  %v3251_v48 = vpack.c.bf16 %v491_v47, %v490_v46 }
 0x2ee   : > { %2211 = vmatprep.subr.bf16.mxu0 %v3169_v54 }
 0x2f1   : > { %2213 = vmatpush3.bf16.msra.mxu0 %v3169_v54  ;;  %v3259_v54 = vpack.c.bf16 %v495_v53, %v494_v52 }
 0x2f4   : > { %1975 = vmatmul.mubr.f32.vlgmr.msra.gmra.mrb[4].mxu0 %v477_v21 }
 0x2f5   : > { %2023 = vmatprep.mubr.msk.f32.mxu0 %vm597_vm0, %v480_v63 }
 0x3a7   : > { %v3230_v24 = vpop.f32.mrb[2].mxu0 }
 0x3a8   : > { %v3232_v25 = vpop.f32.mrb[3].mxu0  ;;  %v986_v15 = vmul.f32 %v3230_v24, %v521_v14 }
 0x3aa   : > { %v2332_v16 = vround.rtne.f32 %v986_v15 }
 0x3ac   : > { %v990_v18 = vmul.f32 %v2332_v16, %v517_v17 }
 0x3c7   : > { %v1976_v30 = vpop.f32.mrb[4].mxu0 }
 0x3c8   : > { %v895_v31 = vpop.f32.mrb[5].mxu0 }
 0x3c9   : > { %v2214_v32 = vpack.c.bf16 %v1976_v30, %v895_v31 }
 0x3cb   : > { %2215 = vmatprep.subr.bf16.mxu1 %v2214_v32 }
 0x3cc   : > { %2217 = vmatpush3.bf16.msra.mxu1 %v2214_v32 }
 0x3cd   : > { %2219 = vmatprep.subr.bf16.mxu1 %v3234_v33 }
 0x3cf   : > { %1982 = vmatmul.mubr.msk.f32.vlgmr.msra.gmra.mrb[4].mxu1 %vm597_vm0, %v3180_v2  ;;  %v520_v2 = vld [vmem:[#allocation13 + $0x10] sm:$0xff] }
 0x3d0   : > { %2221 = vmatpush3.bf16.msra.mxu1 %v3234_v33  ;;  %2016 = vmatprep.mubr.f32.mxu1 %v983_v39  ;;  %v985_v4 = vmul.f32 %v3232_v25, %v520_v2 }
 0x3d1   : > { %2223 = vmatprep.subr.bf16.mxu1 %v3237_v38 }
 0x3d2   : > { %v2331_v10 = vround.rtne.f32 %v985_v4 }
 0x3d4   : > { %2225 = vmatpush3.bf16.msra.mxu1 %v3237_v38  ;;  %v989_v13 = vmul.f32 %v2331_v10, %v516_v11 }
 0x3d5   : > { %2227 = vmatprep.subr.bf16.mxu1 %v3243_v42 }
 0x3d8   : > { %2229 = vmatpush3.bf16.msra.mxu1 %v3243_v42 }
 0x3d9   : > { %2231 = vmatprep.subr.bf16.mxu1 %v3247_v45 }
 0x3dc   : > { %2233 = vmatpush3.bf16.msra.mxu1 %v3247_v45 }
 0x3dd   : > { %2235 = vmatprep.subr.bf16.mxu1 %v3251_v48 }
 0x3e0   : > { %2237 = vmatpush3.bf16.msra.mxu1 %v3251_v48 }
 0x3e1   : > { %2239 = vmatprep.subr.bf16.mxu1 %v3255_v51 }
 0x3e4   : > { %2241 = vmatpush3.bf16.msra.mxu1 %v3255_v51 }
 0x3e5   : > { %2243 = vmatprep.subr.bf16.mxu1 %v3259_v54 }
 0x3e8   : > { %2245 = vmatpush3.bf16.msra.mxu1 %v3259_v54 }
 0x3e9   : > { %2247 = vmatprep.subr.bf16.mxu1 %v3264_v59 }
 0x3ec   : > { %2249 = vmatpush3.bf16.msra.mxu1 %v3264_v59 }
 0x3ef   : > { %2017 = vmatmul.mubr.f32.vlgmr.msra.gmra.mrb[6].mxu1 %v984_v62 }
 0x3f0   : > { %2065 = vmatprep.mubr.msk.f32.mxu1 %vm597_vm0, %v480_v63 }
 0x4a2   : > { %v1983_v0 = vpop.f32.mrb[4].mxu1 }
 0x4a3   : > { %v970_v1 = vpop.f32.mrb[5].mxu1  ;;  %v992_v24 = vmul.f32 %v1983_v0, %v521_v14 }
 0x4a4   : > { %v991_v22 = vmul.f32 %v970_v1, %v520_v2 }
 0x4a5   : > { %v2334_v25 = vround.rtne.f32 %v992_v24 }
 0x4a6   : > { %v2333_v8 = vround.rtne.f32 %v991_v22 }
 0x4a7   : > { %v996_v26 = vmul.f32 %v2334_v25, %v517_v17 }
 0x4a8   : > { %v995_v21 = vmul.f32 %v2333_v8, %v516_v11 }
 0x4c2   : > { %v2018_v6 = vpop.f32.mrb[6].mxu1 }
 0x4c3   : > { %v1063_v7 = vpop.f32.mrb[7].mxu1 }
 0x4c4   : > { %v2250_v9 = vpack.c.bf16 %v2018_v6, %v1063_v7 }
 0x4c6   : > { %2251 = vmatprep.subr.bf16.mxu0 %v2250_v9 }
 0x4c7   : > { %2253 = vmatpush3.bf16.msra.mxu0 %v2250_v9 }
 0x4c8   : > { %2255 = vmatprep.subr.bf16.mxu0 %v3234_v33 }
 0x4ca   : > { %2024 = vmatmul.mubr.msk.f32.vlgmr.msra.gmra.mrb[6].mxu0 %vm597_vm0, %v3272_v12 }
 0x4cb   : > { %2257 = vmatpush3.bf16.msra.mxu0 %v3234_v33  ;;  %2058 = vmatprep.mubr.f32.mxu0 %v989_v13 }
 0x4cc   : > { %2259 = vmatprep.subr.bf16.mxu0 %v3237_v38 }
 0x4cf   : > { %2261 = vmatpush3.bf16.msra.mxu0 %v3237_v38 }
 0x4d0   : > { %2263 = vmatprep.subr.bf16.mxu0 %v3243_v42 }
 0x4d3   : > { %2265 = vmatpush3.bf16.msra.mxu0 %v3243_v42 }
 0x4d4   : > { %2267 = vmatprep.subr.bf16.mxu0 %v3247_v45 }
 0x4d7   : > { %2269 = vmatpush3.bf16.msra.mxu0 %v3247_v45 }
 0x4d8   : > { %2271 = vmatprep.subr.bf16.mxu0 %v3251_v48 }
 0x4db   : > { %2273 = vmatpush3.bf16.msra.mxu0 %v3251_v48 }
 0x4dc   : > { %2275 = vmatprep.subr.bf16.mxu0 %v3255_v51 }
 0x4df   : > { %2277 = vmatpush3.bf16.msra.mxu0 %v3255_v51 }
 0x4e0   : > { %2279 = vmatprep.subr.bf16.mxu0 %v3259_v54 }
 0x4e3   : > { %2281 = vmatpush3.bf16.msra.mxu0 %v3259_v54 }
 0x4e4   : > { %2283 = vmatprep.subr.bf16.mxu0 %v3264_v59 }
 0x4e7   : > { %2285 = vmatpush3.bf16.msra.mxu0 %v3264_v59 }
 0x4ea   : > { %2059 = vmatmul.mubr.f32.vlgmr.msra.gmra.mrb[8].mxu0 %v990_v18 }
 0x4eb   : > { %2107 = vmatprep.mubr.msk.f32.mxu0 %vm597_vm0, %v480_v63 }
 0x59d   : > { %v3294_v19 = vpop.f32.mrb[6].mxu0 }
 0x59e   : > { %v3296_v20 = vpop.f32.mrb[7].mxu0 }
 0x5bd   : > { %v2060_v3 = vpop.f32.mrb[8].mxu0 }
 0x5be   : > { %v1219_v23 = vpop.f32.mrb[9].mxu0 }
 0x5bf   : > { %v2286_v5 = vpack.c.bf16 %v2060_v3, %v1219_v23 }
 0x5c1   : > { %2287 = vmatprep.subr.bf16.mxu1 %v2286_v5 }
 0x5c2   : > { %2289 = vmatpush3.bf16.msra.mxu1 %v2286_v5 }
 0x5c3   : > { %2291 = vmatprep.subr.bf16.mxu1 %v3234_v33 }
 0x5c5   : > { %2066 = vmatmul.mubr.msk.f32.vlgmr.msra.gmra.mrb[8].mxu1 %vm597_vm0, %v3272_v12 }
 0x5c6   : > { %2293 = vmatpush3.bf16.msra.mxu1 %v3234_v33  ;;  %2100 = vmatprep.mubr.f32.mxu1 %v995_v21 }
 0x5c7   : > { %2295 = vmatprep.subr.bf16.mxu1 %v3237_v38 }
 0x5ca   : > { %2297 = vmatpush3.bf16.msra.mxu1 %v3237_v38 }
 0x5cb   : > { %2299 = vmatprep.subr.bf16.mxu1 %v3243_v42 }
 0x5ce   : > { %2301 = vmatpush3.bf16.msra.mxu1 %v3243_v42 }
 0x5cf   : > { %2303 = vmatprep.subr.bf16.mxu1 %v3247_v45 }
 0x5d2   : > { %2305 = vmatpush3.bf16.msra.mxu1 %v3247_v45 }
 0x5d3   : > { %2307 = vmatprep.subr.bf16.mxu1 %v3251_v48 }
 0x5d6   : > { %2309 = vmatpush3.bf16.msra.mxu1 %v3251_v48 }
 0x5d7   : > { %2311 = vmatprep.subr.bf16.mxu1 %v3255_v51 }
 0x5da   : > { %2313 = vmatpush3.bf16.msra.mxu1 %v3255_v51 }
 0x5db   : > { %2315 = vmatprep.subr.bf16.mxu1 %v3259_v54 }
 0x5de   : > { %2317 = vmatpush3.bf16.msra.mxu1 %v3259_v54 }
 0x5df   : > { %2319 = vmatprep.subr.bf16.mxu1 %v3264_v59 }
 0x5e2   : > { %2321 = vmatpush3.bf16.msra.mxu1 %v3264_v59 }
 0x5e5   : > { %2101 = vmatmul.mubr.f32.vlgmr.msra.gmra.mrb[10].mxu1 %v996_v26 }
 0x698   : > { %v2067_v27 = vpop.f32.mrb[8].mxu1 }
 0x699   : > { %v1458_v28 = vmul.f32 0.3441133, %v2067_v27  ;;  %v1466_v29 = vmul.f32 1.7719781, %v2067_v27  ;;  %v1294_v30 = vpop.f32.mrb[9].mxu1 }
 0x69a   : > { %v1457_v31 = vmul.f32 0.3441133, %v1294_v30  ;;  %v1465_v32 = vmul.f32 1.7719781, %v1294_v30 }
 0x69b   : > { %v1460_v33 = vsub.f32 %v3294_v19, %v1458_v28  ;;  %v1468_v34 = vadd.f32 %v3294_v19, %v1466_v29 }
 0x69c   : > { %v1459_v35 = vsub.f32 %v3296_v20, %v1457_v31  ;;  %v1467_v36 = vadd.f32 %v1465_v32, %v3296_v20 }
 0x69d   : > { %v1491_v37 = vmul.f32 0.007843138, %v1468_v34 }
 0x69e   : > { %v1490_v38 = vmul.f32 0.007843138, %v1467_v36 }
 0x69f   : > { %v1718_v39 = vadd.f32 -1.0, %v1491_v37 }
 0x6a0   : > { %v1717_v40 = vadd.f32 -1.0, %v1490_v38 }
 0x6a1   : > { %v1720_v41 = vclamps-f32 %v1718_v39, 1.0 }
 0x6a2   : > { %v1719_v42 = vclamps-f32 %v1717_v40, 1.0 }
 0x6a3   : > { %1722 = vst [vmem:[%s3322_s8 + $0x28] sm:$0xff] %v1720_v41 }
 0x6a4   : > { %1721 = vst [vmem:[%s3322_s8 + $0x20] sm:$0xff] %v1719_v42 }
 0x6b8   : > { %v2102_v43 = vpop.f32.mrb[10].mxu1 }
 0x6b9   : > { %v1369_v44 = vpop.f32.mrb[11].mxu1 }
 0x6ba   : > { %v2322_v45 = vpack.c.bf16 %v2102_v43, %v1369_v44 }
 0x6bc   : > { %2323 = vmatprep.subr.bf16.mxu0 %v2322_v45 }
 0x6bd   : > { %2325 = vmatpush3.bf16.msra.mxu0 %v2322_v45 }
 0x6c0   : > { %2108 = vmatmul.mubr.msk.f32.vlgmr.msra.gmra.mrb[10].mxu0 %vm597_vm0, %v3272_v12 }
 0x793   : > { %v2109_v46 = vpop.f32.mrb[10].mxu0 }
 0x794   : > { %v1454_v47 = vmul.f32 1.4019876, %v2109_v46  ;;  %v1462_v48 = vmul.f32 0.7141038, %v2109_v46  ;;  %v1444_v49 = vpop.f32.mrb[11].mxu0 }
 0x795   : > { %v1453_v50 = vmul.f32 1.4019876, %v1444_v49  ;;  %v1461_v51 = vmul.f32 0.7141038, %v1444_v49 }
 0x796   : > { %v1456_v52 = vadd.f32 %v3294_v19, %v1454_v47  ;;  %v1464_v53 = vsub.f32 %v1460_v33, %v1462_v48 }
 0x797   : > { %v1455_v54 = vadd.f32 %v1453_v50, %v3296_v20  ;;  %v1463_v55 = vsub.f32 %v1459_v35, %v1461_v51 }
 0x798   : > { %v1470_v56 = vmul.f32 0.007843138, %v1456_v52  ;;  %v1480_v57 = vmul.f32 0.007843138, %v1464_v53 }
 0x799   : > { %v1469_v58 = vmul.f32 0.007843138, %v1455_v54  ;;  %v1479_v59 = vmul.f32 0.007843138, %v1463_v55 }
 0x79a   : > { %v1708_v60 = vadd.f32 -1.0, %v1470_v56  ;;  %v1712_v61 = vadd.f32 -1.0, %v1480_v57 }
 0x79b   : > { %v1707_v62 = vadd.f32 -1.0, %v1469_v58  ;;  %v1711_v63 = vadd.f32 -1.0, %v1479_v59 }
 0x79c   : > { %v1710_v0 = vclamps-f32 %v1708_v60, 1.0  ;;  %v1714_v1 = vclamps-f32 %v1712_v61, 1.0 }
 0x79d   : > { %v1709_v2 = vclamps-f32 %v1707_v62, 1.0  ;;  %v1713_v4 = vclamps-f32 %v1711_v63, 1.0 }
 0x79e   : > { %1478 = vst [vmem:[%s3322_s8 + $0x8] sm:$0xff] %v1710_v0  ;;  %1716 = vst [vmem:[%s3322_s8 + $0x18] sm:$0xff] %v1714_v1 }
 0x79f   : > { %1477 = vst [vmem:[%s3322_s8] sm:$0xff] %v1709_v2  ;;  %1715 = vst [vmem:[%s3322_s8 + $0x10] sm:$0xff] %v1713_v4 }
 0x7a0   : > { %2674 = shalt.err (!%p2671_p8)
}
 0x7a1   : > { %s2675_s17 = scalar_lea.hbm %s3337_s13, 768  ;;  %s2679_s14 = scalar_lea.hbm %s3426_s1, 1536 }
 0x7a2   : > { %p2676_p3 = scmp.ne.s32.totalorder %s3337_s13, %s2675_s17  ;;  %p2680_p13 = scmp.lt.u32.totalorder %s3337_s13, %s3426_s1 }
 0x7a3   : > { %p2681_p1 = scmp.lt.u32.totalorder %s2679_s14, %s2675_s17  ;;  %p2683_p2 = scmp.lt.u32.totalorder %s2675_s17, %s3337_s13 }
 0x7a4   : > { %p2677_p12 = pnand %p2676_p3, %p3427_p9 }
 0x7a5   : > { %p2682_p4 = por %p2681_p1, %p2680_p13 }
 0x7a6   : > { %p2678_p6 = pneg %p2677_p12 }
 0x7a7   : > { %p2684_p10 = por %p2683_p2, %p2682_p4 }
 0x7a9   : > { %p2685_p11 = pnand %p2684_p10, %p2678_p6 }
 0x7ab   : > { %2688 = shalt.err (!%p2685_p11)
}
 0x7ac   : > { %s2767_s12 = smov 128   ;;  %s2768_s30 = smov 8  }
 0x7ad   : > { %2362 = dma.vmem_to_hbm [thread:$0]  (%p3427_p9), %s3332_s9, 768, %s3337_s13, %s1502_s27, %s2767_s12, %s2767_s12, %s2768_s30  }
 0x7ae PF: > { %s1533_s20 = sand.u32 1, %s2735_s24   ;;  %p3428_p0 = scmp.ne.s32.totalorder %s3420_s10, 0 }
 0x7af   : > { %p3429_p7 = scmp.ge.s32.totalorder %s2755_s29, 2  ;;  %s1534_s16 = scalar_lea.sflag [#allocation4], %s1533_s20 }
 0x7b1   : > { %p2388_p5 = pnand %p3429_p7, %p3428_p0 }
 0x7b3   : > { %2730 = dma.done.wait (!%p2388_p5), %s1534_s16, 768  }
 0x7b4   : > { %2732 = vsyncadd (!%p2388_p5), %s1534_s16, 4294966528  ;;  %s26_s29 = sadd.s32 1, %s2755_s29   ;;  %s3430_s24 = smov %s2739_s25 }
 0x7b5   : > { %p23_p8 = scmp.ge.s32.totalorder %s26_s29, 4   ;;  %s3431_s25 = smov %s2743_s26 }
 0x7b6   : > { %s3432_s26 = smov %s3039_s23  ;;  %s3433_s27 = smov %s2751_s28 }
 0x7b7   : > { %s3434_s28 = smov %s3436_s22  ;;  %25 = sbr.rel (!%p23_p8) target bundleno = 13 (0xd), region = 121 }
 0x7be   :  { %1539 = vsyncpa [#allocation3], 1 }
 0x7bf   :  { %1541 = vsyncpa [#allocation3 + $0x1], 1 }
 0x7c0   :  { %1542 = vsyncpa [#allocation6], 1 }
 0x7c1   :  { %1543 = vsyncpa [#allocation9], 1 }
 0x7c2   :  { %1544 = vsyncpa [#allocation12], 1 }
 0x7c3   :  { %1545 = vsyncpa [#allocation4], 1 }
 0x7c4   :  { %1547 = vsyncpa [#allocation4 + $0x1], 1 }

</bundles_post_ra>
